<compile_context>
chip_gen: v7x
topology: tpu7x:2x2x1
jax: 0.10.0
libtpu: 0.0.40
codegen_flags: <defaults>
</compile_context>

<pallas_src>
import functools

import jax
import jax.numpy as jnp
from jax.experimental import pallas as pl
from jax.experimental.pallas import tpu as pltpu

BN_EPS = 1e-5  # PyTorch BatchNorm2d default


# --------------------------------------------------------------------------
# Pass 1: 1x1 conv (spatial in lanes) + per-batch partial channel stats.
# --------------------------------------------------------------------------
def _conv_stats_kernel(x_ref, wt_ref, y_ref, sum_ref, sq_ref):
    # x_ref  : (1, C, TILE_S)   input tile, spatial in lanes
    # wt_ref : (Co, C)          resident weight block
    # y_ref  : (1, Co, TILE_S)  unnormalized conv tile (bf16 or f32)
    # sum_ref: (1, Co, 1)       per-batch partial sum   (resident across s)
    # sq_ref : (1, Co, 1)       per-batch partial sum^2 (resident across s)
    s = pl.program_id(1)

    @pl.when(s == 0)
    def _init():
        sum_ref[...] = jnp.zeros_like(sum_ref)
        sq_ref[...] = jnp.zeros_like(sq_ref)

    x = x_ref[0]          # (C, TILE_S)
    wt = wt_ref[...]      # (Co, C)

    # 1x1 conv == per-pixel channel matmul.  Conv bias intentionally omitted:
    # a constant per-channel offset cancels exactly under train-mode BN's mean
    # subtraction.  The kernel is HBM-bound, so MXU padding from small C/Co is
    # free filler — do not restructure for MXU utilization.
    y = jnp.dot(wt, x, preferred_element_type=jnp.float32)   # (Co, TILE_S) f32

    # Store the intermediate in the (possibly bf16) output dtype; stats are
    # accumulated on the pre-cast f32 y so scale/shift numerics are unchanged.
    y_ref[0] = y.astype(y_ref.dtype)                          # lane-dense store

    sum_ref[0] += jnp.sum(y, axis=1, keepdims=True)           # (Co, 1)
    sq_ref[0] += jnp.sum(y * y, axis=1, keepdims=True)        # (Co, 1)


# --------------------------------------------------------------------------
# Pass 2: normalize — one FMA per element, every tile independent.
# --------------------------------------------------------------------------
def _bn_apply_kernel(y_ref, scale_ref, shift_ref, o_ref):
    y = y_ref[0].astype(jnp.float32)                          # (Co, TILE_S)
    o_ref[0] = (y * scale_ref[...] + shift_ref[...]).astype(o_ref.dtype)


# --------------------------------------------------------------------------
# Tiling / VMEM helpers.
# --------------------------------------------------------------------------
def _choose_tile_s(s_pad, bytes_per_lane):
    """Spatial (lane) tile.  s_pad is a multiple of 128.

    Budget: <=6 MiB per streamed block pair, so the double-buffered working
    set (~2x) plus resident weight/stat blocks stays inside every
    generation's default scoped-VMEM limit (v5e 16 MiB, v6e 32 MiB, v7x
    32 MiB default / 64 MiB physical).  Floor of 512 lanes (128-lane tiles
    reach only ~29% of HBM roofline vs ~85% at 512), ceiling of 2048 lanes
    (diminishing returns past ~1024-2048)."""
    budget = 6 * 1024 * 1024
    floor = min(512, s_pad)
    ceil = min(2048, s_pad)
    cap = max((budget // bytes_per_lane) // 128 * 128, 128)
    target = max(min(cap, ceil), floor)
    t = min(target, s_pad)
    t = (t // 128) * 128
    while t > 128 and s_pad % t != 0:
        t -= 128
    return max(t, 128)


def _compiler_params(dims, block_pair_bytes, resident_bytes):
    # Double-buffered streamed blocks + resident blocks + headroom.  Only raise
    # vmem_limit_bytes when the estimate actually needs it (wide channel
    # counts); 48 MiB cap keeps headroom under v7x's 64 MiB physical VMEM.
    est = 2 * block_pair_bytes + resident_bytes + (2 << 20)
    kwargs = {}
    if est > (12 << 20):
        kwargs["vmem_limit_bytes"] = min(2 * est, 48 << 20)
    return pltpu.CompilerParams(dimension_semantics=dims, **kwargs)


# --------------------------------------------------------------------------
# Forward.
# --------------------------------------------------------------------------
@functools.partial(jax.jit, static_argnames=("intermediate_dtype",))
def imageknet_forward(x, weight, bias, gamma, beta,
                      intermediate_dtype=jnp.bfloat16):
    """x: (B, C, W, H) f32; weight: (Co, C) (1x1-conv, kernel dims squeezed);
    bias: (Co,); gamma/beta: (Co,).
    Returns (B, Co, W*H) f32 == BatchNorm2d(Conv2d_1x1(x)).view(B, -1, W*H)
    in training mode (batch statistics)."""
    del bias  # cancels exactly under train-mode BN mean subtraction
    B, C, W, H = x.shape
    Co = weight.shape[0]
    S = W * H
    out_dtype = jnp.dtype(jnp.float32)
    y_dtype = jnp.dtype(intermediate_dtype)
    y_bytes = y_dtype.itemsize

    x3 = x.astype(jnp.float32).reshape(B, C, S)   # free view of NCHW
    # Pad awkward spatial extents to a multiple of 128 so tiles stay
    # lane-dense and pipelined; zero padding is stats-neutral because inv_n
    # below divides by the true element count.
    S_pad = ((S + 127) // 128) * 128
    if S_pad != S:
        x3 = jnp.pad(x3, ((0, 0), (0, 0), (0, S_pad - S)))

    wt = weight.astype(jnp.float32)               # (Co, C), resident in VMEM

    tile_s = _choose_tile_s(S_pad, C * 4 + Co * y_bytes)
    n_s = S_pad // tile_s
    inv_n = 1.0 / float(B * S)

    pair1 = tile_s * (C * 4 + Co * y_bytes)
    resident1 = Co * C * 4 + 2 * Co * 4 * 128

    # ---- Pass 1: conv + per-batch partial stats ------------------------------
    y_raw, psum, psq = pl.pallas_call(
        _conv_stats_kernel,
        out_shape=(
            jax.ShapeDtypeStruct((B, Co, S_pad), y_dtype),     # unnormalized y
            jax.ShapeDtypeStruct((B, Co, 1), jnp.float32),     # per-b sum
            jax.ShapeDtypeStruct((B, Co, 1), jnp.float32),     # per-b sum^2
        ),
        grid=(B, n_s),
        in_specs=[
            pl.BlockSpec((1, C, tile_s), lambda b, s: (b, 0, s)),
            pl.BlockSpec((Co, C), lambda b, s: (0, 0)),
        ],
        out_specs=(
            pl.BlockSpec((1, Co, tile_s), lambda b, s: (b, 0, s)),
            pl.BlockSpec((1, Co, 1), lambda b, s: (b, 0, 0)),
            pl.BlockSpec((1, Co, 1), lambda b, s: (b, 0, 0)),
        ),
        compiler_params=_compiler_params(
            # per-b partial stats have no cross-b dependency -> batch axis can
            # shard across v7x's two TensorCores; s stays the reduction axis.
            ("parallel", "arbitrary"), pair1, resident1),
        cost_estimate=pl.CostEstimate(
            flops=2 * B * S_pad * C * Co,
            transcendentals=0,
            bytes_accessed=B * S_pad * (C * 4 + Co * y_bytes) + Co * C * 4),
    )(x3, wt)

    # ---- Stats finalize (tiny, plain JAX): fold BN affine into one FMA -------
    total_sum = jnp.sum(psum, axis=0)             # (Co, 1)
    total_sq = jnp.sum(psq, axis=0)               # (Co, 1)
    mean = total_sum * inv_n
    var = jnp.maximum(total_sq * inv_n - mean * mean, 0.0)
    scale = gamma.reshape(Co, 1).astype(jnp.float32) * jax.lax.rsqrt(var + BN_EPS)
    shift = beta.reshape(Co, 1).astype(jnp.float32) - mean * scale

    # ---- Pass 2: normalize + write final (B, Co, S) ---------------------------
    pair2 = tile_s * Co * (y_bytes + 4)
    out_padded = pl.pallas_call(
        _bn_apply_kernel,
        out_shape=jax.ShapeDtypeStruct((B, Co, S_pad), out_dtype),
        grid=(B, n_s),
        in_specs=[
            pl.BlockSpec((1, Co, tile_s), lambda b, s: (b, 0, s)),
            pl.BlockSpec((Co, 1), lambda b, s: (0, 0)),
            pl.BlockSpec((Co, 1), lambda b, s: (0, 0)),
        ],
        out_specs=pl.BlockSpec((1, Co, tile_s), lambda b, s: (b, 0, s)),
        # Normalize in place (free peak-HBM saving) when dtypes allow aliasing.
        input_output_aliases=({0: 0} if y_dtype == out_dtype else {}),
        compiler_params=_compiler_params(
            # every tile independent -> both v7x TensorCores stream it
            ("parallel", "parallel"), pair2, 2 * Co * 4 * 128),
        cost_estimate=pl.CostEstimate(
            flops=2 * B * Co * S_pad,
            transcendentals=0,
            bytes_accessed=B * Co * S_pad * (y_bytes + 4)),
    )(y_raw, scale, shift)

    if S_pad != S:
        out_padded = out_padded[:, :, :S]
    return out_padded


def reference_forward(x, weight, bias, gamma, beta):
    """Pure-JAX reference mirroring PyTorch Conv2d(1x1, bias)+BatchNorm2d(train)."""
    B, C, W, H = x.shape
    Co = weight.shape[0]
    y = jnp.einsum("oc,bcwh->bowh", weight, x,
                   precision="highest") + bias.reshape(1, Co, 1, 1)
    mean = jnp.mean(y, axis=(0, 2, 3), keepdims=True)
    var = jnp.mean((y - mean) ** 2, axis=(0, 2, 3), keepdims=True)
    yn = (y - mean) / jnp.sqrt(var + BN_EPS)
    yn = yn * gamma.reshape(1, Co, 1, 1) + beta.reshape(1, Co, 1, 1)
    return yn.reshape(B, Co, W * H)


if __name__ == "__main__":
    # Small shapes consistent with the module's first stage: Conv2d(12 -> 64).
    B, C, W, H = 2, 12, 16, 16
    Co = 64

    key = jax.random.PRNGKey(0)
    kx, kw, kb = jax.random.split(key, 3)

    x = jax.random.normal(kx, (B, C, W, H), dtype=jnp.float32)

    # Conv parameters in PyTorch layout (Co, C); uniform init with bound
    # 1/sqrt(fan_in) like PyTorch's default.
    bound = (1.0 / C) ** 0.5
    weight = jax.random.uniform(kw, (Co, C), jnp.float32, -bound, bound)
    bias = jax.random.uniform(kb, (Co,), jnp.float32, -bound, bound)

    # BatchNorm2d affine params: PyTorch default init gamma=1, beta=0.
    gamma = jnp.ones((Co,), jnp.float32)
    beta = jnp.zeros((Co,), jnp.float32)

    ref = reference_forward(x, weight, bias, gamma, beta)

    # Default path: bf16 intermediate (halves the y HBM round trip).
    out_bf16 = jax.block_until_ready(
        imageknet_forward(x, weight, bias, gamma, beta))
    assert out_bf16.shape == (B, Co, W * H), out_bf16.shape
    err_bf16 = float(jnp.max(jnp.abs(out_bf16 - ref)))
    assert jnp.allclose(out_bf16, ref, atol=5e-2, rtol=5e-2), err_bf16

    # f32-intermediate path (tighter numerics; also exercises in-place aliasing).
    out_f32 = jax.block_until_ready(
        imageknet_forward(x, weight, bias, gamma, beta,
                          intermediate_dtype=jnp.float32))
    err_f32 = float(jnp.max(jnp.abs(out_f32 - ref)))
    assert jnp.allclose(out_f32, ref, atol=5e-3, rtol=5e-3), err_f32

    print("KERNEL_OK")
</pallas_src>

<mosaic_0001>
module attributes {stable_mosaic.version = 11 : i64} {
  func.func @_conv_stats_kernel(%arg0: i32, %arg1: i32, %arg2: memref<1x12x256xf32, #tpu.memory_space<vmem>>, %arg3: memref<64x12xf32, #tpu.memory_space<vmem>>, %arg4: memref<1x64x256xbf16, #tpu.memory_space<vmem>>, %arg5: memref<1x64x1xf32, #tpu.memory_space<vmem>>, %arg6: memref<1x64x1xf32, #tpu.memory_space<vmem>>) attributes {dimension_semantics = [#tpu.dimension_semantics<parallel>, #tpu.dimension_semantics<arbitrary>], iteration_bounds = array<i64: 2, 1>, scalar_prefetch = 0 : i64, scratch_operands = 0 : i64, tpu.core_type = #tpu.core_type<tc>, window_params = [{transform_indices = @transform_0, window_bounds = array<i64: 1, 12, 256>}, {pipeline_mode = #tpu.pipeline_mode<synchronous>, transform_indices = @transform_1, window_bounds = array<i64: 64, 12>}, {transform_indices = @transform_2, window_bounds = array<i64: 1, 64, 256>}, {transform_indices = @transform_3, window_bounds = array<i64: 1, 64, 1>}, {transform_indices = @transform_4, window_bounds = array<i64: 1, 64, 1>}]} {
    %c0_i32 = arith.constant 0 : i32
    %0 = arith.cmpi eq, %arg1, %c0_i32 : i32
    %1 = arith.extui %0 : i1 to i32
    %c0_i32_0 = arith.constant 0 : i32
    %2 = arith.cmpi ne, %1, %c0_i32_0 : i32
    scf.if %2 {
      %cst_22 = arith.constant 0.000000e+00 : f32
      %28 = vector.broadcast %cst_22 : f32 to vector<1x64x1xf32>
      %c0_23 = arith.constant 0 : index
      %c0_24 = arith.constant 0 : index
      %c0_25 = arith.constant 0 : index
      %29 = vector.load %arg5[%c0_23, %c0_24, %c0_25] : memref<1x64x1xf32, #tpu.memory_space<vmem>>, vector<1x64x1xf32>
      tpu.vector_store %arg5[%c0_23, %c0_24, %c0_25], %28 {strides = array<i32>} : memref<1x64x1xf32, #tpu.memory_space<vmem>>, vector<1x64x1xf32>,
      %cst_26 = arith.constant 0.000000e+00 : f32
      %30 = vector.broadcast %cst_26 : f32 to vector<1x64x1xf32>
      %c0_27 = arith.constant 0 : index
      %c0_28 = arith.constant 0 : index
      %c0_29 = arith.constant 0 : index
      %31 = vector.load %arg6[%c0_27, %c0_28, %c0_29] : memref<1x64x1xf32, #tpu.memory_space<vmem>>, vector<1x64x1xf32>
      tpu.vector_store %arg6[%c0_27, %c0_28, %c0_29], %30 {strides = array<i32>} : memref<1x64x1xf32, #tpu.memory_space<vmem>>, vector<1x64x1xf32>,
    } else {
    }
    %c0 = arith.constant 0 : index
    %c0_1 = arith.constant 0 : index
    %c0_2 = arith.constant 0 : index
    %3 = vector.load %arg2[%c0, %c0_1, %c0_2] : memref<1x12x256xf32, #tpu.memory_space<vmem>>, vector<1x12x256xf32>
    %4 = vector.shape_cast %3 : vector<1x12x256xf32> to vector<12x256xf32>
    %c0_3 = arith.constant 0 : index
    %c0_4 = arith.constant 0 : index
    %5 = vector.load %arg3[%c0_3, %c0_4] : memref<64x12xf32, #tpu.memory_space<vmem>>, vector<64x12xf32>
    %cst = arith.constant dense<0.000000e+00> : vector<64x256xf32>
    %6 = tpu.matmul %5, %4, %cst {dimension_numbers = #tpu.dot_dimension_numbers<[1], [0], [0], [1], [0, 0, 1, 1], [], []>} : vector<64x12xf32>, vector<12x256xf32>, vector<64x256xf32> -> vector<64x256xf32>
    %7 = arith.truncf %6 : vector<64x256xf32> to vector<64x256xbf16>
    %c0_5 = arith.constant 0 : index
    %c0_6 = arith.constant 0 : index
    %c0_7 = arith.constant 0 : index
    %8 = vector.load %arg4[%c0_5, %c0_6, %c0_7] : memref<1x64x256xbf16, #tpu.memory_space<vmem>>, vector<1x64x256xbf16>
    %9 = vector.shape_cast %8 : vector<1x64x256xbf16> to vector<64x256xbf16>
    %10 = vector.shape_cast %7 : vector<64x256xbf16> to vector<1x64x256xbf16>
    tpu.vector_store %arg4[%c0_5, %c0_6, %c0_7], %10 {strides = array<i32>} : memref<1x64x256xbf16, #tpu.memory_space<vmem>>, vector<1x64x256xbf16>,
    %c0_8 = arith.constant 0 : index
    %c0_9 = arith.constant 0 : index
    %c0_10 = arith.constant 0 : index
    %11 = vector.load %arg5[%c0_8, %c0_9, %c0_10] : memref<1x64x1xf32, #tpu.memory_space<vmem>>, vector<1x64x1xf32>
    %12 = vector.shape_cast %11 : vector<1x64x1xf32> to vector<64x1xf32>
    %cst_11 = arith.constant dense<0.000000e+00> : vector<64xf32>
    %13 = vector.multi_reduction <add>, %6, %cst_11 [1] : vector<64x256xf32> to vector<64xf32>
    %14 = vector.shape_cast %13 : vector<64xf32> to vector<64x1xf32>
    %15 = arith.addf %12, %14 : vector<64x1xf32>
    %c0_12 = arith.constant 0 : index
    %c0_13 = arith.constant 0 : index
    %c0_14 = arith.constant 0 : index
    %16 = vector.load %arg5[%c0_12, %c0_13, %c0_14] : memref<1x64x1xf32, #tpu.memory_space<vmem>>, vector<1x64x1xf32>
    %17 = vector.shape_cast %16 : vector<1x64x1xf32> to vector<64x1xf32>
    %18 = vector.shape_cast %15 : vector<64x1xf32> to vector<1x64x1xf32>
    tpu.vector_store %arg5[%c0_12, %c0_13, %c0_14], %18 {strides = array<i32>} : memref<1x64x1xf32, #tpu.memory_space<vmem>>, vector<1x64x1xf32>,
    %c0_15 = arith.constant 0 : index
    %c0_16 = arith.constant 0 : index
    %c0_17 = arith.constant 0 : index
    %19 = vector.load %arg6[%c0_15, %c0_16, %c0_17] : memref<1x64x1xf32, #tpu.memory_space<vmem>>, vector<1x64x1xf32>
    %20 = vector.shape_cast %19 : vector<1x64x1xf32> to vector<64x1xf32>
    %21 = arith.mulf %6, %6 : vector<64x256xf32>
    %cst_18 = arith.constant dense<0.000000e+00> : vector<64xf32>
    %22 = vector.multi_reduction <add>, %21, %cst_18 [1] : vector<64x256xf32> to vector<64xf32>
    %23 = vector.shape_cast %22 : vector<64xf32> to vector<64x1xf32>
    %24 = arith.addf %20, %23 : vector<64x1xf32>
    %c0_19 = arith.constant 0 : index
    %c0_20 = arith.constant 0 : index
    %c0_21 = arith.constant 0 : index
    %25 = vector.load %arg6[%c0_19, %c0_20, %c0_21] : memref<1x64x1xf32, #tpu.memory_space<vmem>>, vector<1x64x1xf32>
    %26 = vector.shape_cast %25 : vector<1x64x1xf32> to vector<64x1xf32>
    %27 = vector.shape_cast %24 : vector<64x1xf32> to vector<1x64x1xf32>
    tpu.vector_store %arg6[%c0_19, %c0_20, %c0_21], %27 {strides = array<i32>} : memref<1x64x1xf32, #tpu.memory_space<vmem>>, vector<1x64x1xf32>,
    return
  }
  func.func @transform_0(%arg0: i32, %arg1: i32) -> (i32, i32, i32) {
    %c0_i32 = arith.constant 0 : i32
    %c0_i32_0 = arith.constant 0 : i32
    return %arg0, %c0_i32, %arg1 : i32, i32, i32
  }
  func.func @transform_1(%arg0: i32, %arg1: i32) -> (i32, i32) {
    %c0_i32 = arith.constant 0 : i32
    %c0_i32_0 = arith.constant 0 : i32
    %c0_i32_1 = arith.constant 0 : i32
    return %c0_i32, %c0_i32_0 : i32, i32
  }
  func.func @transform_2(%arg0: i32, %arg1: i32) -> (i32, i32, i32) {
    %c0_i32 = arith.constant 0 : i32
    %c0_i32_0 = arith.constant 0 : i32
    return %arg0, %c0_i32, %arg1 : i32, i32, i32
  }
  func.func @transform_3(%arg0: i32, %arg1: i32) -> (i32, i32, i32) {
    %c0_i32 = arith.constant 0 : i32
    %c0_i32_0 = arith.constant 0 : i32
    %c0_i32_1 = arith.constant 0 : i32
    return %arg0, %c0_i32, %c0_i32_0 : i32, i32, i32
  }
  func.func @transform_4(%arg0: i32, %arg1: i32) -> (i32, i32, i32) {
    %c0_i32 = arith.constant 0 : i32
    %c0_i32_0 = arith.constant 0 : i32
    %c0_i32_1 = arith.constant 0 : i32
    return %arg0, %c0_i32, %c0_i32_0 : i32, i32, i32
  }
}

module attributes {stable_mosaic.version = 11 : i64} {
  func.func @_bn_apply_kernel(%arg0: i32, %arg1: i32, %arg2: memref<1x64x256xbf16, #tpu.memory_space<vmem>>, %arg3: memref<64x1xf32, #tpu.memory_space<vmem>>, %arg4: memref<64x1xf32, #tpu.memory_space<vmem>>, %arg5: memref<1x64x256xf32, #tpu.memory_space<vmem>>) attributes {dimension_semantics = [#tpu.dimension_semantics<parallel>, #tpu.dimension_semantics<parallel>], iteration_bounds = array<i64: 2, 1>, scalar_prefetch = 0 : i64, scratch_operands = 0 : i64, tpu.core_type = #tpu.core_type<tc>, window_params = [{transform_indices = @transform_0, window_bounds = array<i64: 1, 64, 256>}, {pipeline_mode = #tpu.pipeline_mode<synchronous>, transform_indices = @transform_1, window_bounds = array<i64: 64, 1>}, {pipeline_mode = #tpu.pipeline_mode<synchronous>, transform_indices = @transform_2, window_bounds = array<i64: 64, 1>}, {transform_indices = @transform_3, window_bounds = array<i64: 1, 64, 256>}]} {
    %c0 = arith.constant 0 : index
    %c0_0 = arith.constant 0 : index
    %c0_1 = arith.constant 0 : index
    %0 = vector.load %arg2[%c0, %c0_0, %c0_1] : memref<1x64x256xbf16, #tpu.memory_space<vmem>>, vector<1x64x256xbf16>
    %1 = vector.shape_cast %0 : vector<1x64x256xbf16> to vector<64x256xbf16>
    %2 = arith.extf %1 : vector<64x256xbf16> to vector<64x256xf32>
    %c0_2 = arith.constant 0 : index
    %c0_3 = arith.constant 0 : index
    %3 = vector.load %arg3[%c0_2, %c0_3] : memref<64x1xf32, #tpu.memory_space<vmem>>, vector<64x1xf32>
    %4 = vector.broadcast %3 : vector<64x1xf32> to vector<64x256xf32>
    %5 = arith.mulf %2, %4 : vector<64x256xf32>
    %c0_4 = arith.constant 0 : index
    %c0_5 = arith.constant 0 : index
    %6 = vector.load %arg4[%c0_4, %c0_5] : memref<64x1xf32, #tpu.memory_space<vmem>>, vector<64x1xf32>
    %7 = vector.broadcast %6 : vector<64x1xf32> to vector<64x256xf32>
    %8 = arith.addf %5, %7 : vector<64x256xf32>
    %c0_6 = arith.constant 0 : index
    %c0_7 = arith.constant 0 : index
    %c0_8 = arith.constant 0 : index
    %9 = vector.load %arg5[%c0_6, %c0_7, %c0_8] : memref<1x64x256xf32, #tpu.memory_space<vmem>>, vector<1x64x256xf32>
    %10 = vector.shape_cast %9 : vector<1x64x256xf32> to vector<64x256xf32>
    %11 = vector.shape_cast %8 : vector<64x256xf32> to vector<1x64x256xf32>
    tpu.vector_store %arg5[%c0_6, %c0_7, %c0_8], %11 {strides = array<i32>} : memref<1x64x256xf32, #tpu.memory_space<vmem>>, vector<1x64x256xf32>,
    return
  }
  func.func @transform_0(%arg0: i32, %arg1: i32) -> (i32, i32, i32) {
    %c0_i32 = arith.constant 0 : i32
    %c0_i32_0 = arith.constant 0 : i32
    return %arg0, %c0_i32, %arg1 : i32, i32, i32
  }
  func.func @transform_1(%arg0: i32, %arg1: i32) -> (i32, i32) {
    %c0_i32 = arith.constant 0 : i32
    %c0_i32_0 = arith.constant 0 : i32
    %c0_i32_1 = arith.constant 0 : i32
    return %c0_i32, %c0_i32_0 : i32, i32
  }
  func.func @transform_2(%arg0: i32, %arg1: i32) -> (i32, i32) {
    %c0_i32 = arith.constant 0 : i32
    %c0_i32_0 = arith.constant 0 : i32
    %c0_i32_1 = arith.constant 0 : i32
    return %c0_i32, %c0_i32_0 : i32, i32
  }
  func.func @transform_3(%arg0: i32, %arg1: i32) -> (i32, i32, i32) {
    %c0_i32 = arith.constant 0 : i32
    %c0_i32_0 = arith.constant 0 : i32
    return %arg0, %c0_i32, %arg1 : i32, i32, i32
  }
}

</mosaic_0001>

<bundles_post_ra>
// kernel: imageknet_forward.3
= control target key start
LH: loop header
LB: loop body
LE: loop exit
PB: predicated region body
PF: predicated region fallthrough
CT: control target
= control target key end

     0   :  { %8 = vsyncpa [#allocation3], 0  ;;  %s838_s0 = inlined_call_operand.vmem [shape: bf16[2,64,256], index: 0, kind: input, shape index: {}]   ;;  %s839_s1 = inlined_call_operand.vmem [shape: f32[64,1], index: 1, kind: input, shape index: {}]   ;;  %s840_s2 = inlined_call_operand.vmem [shape: f32[64,1], index: 2, kind: input, shape index: {}]   ;;  %s841_s3 = inlined_call_operand.hbm [shape: f32[2,64,256], index: 3, kind: output, shape index: {}]  }
   0x1   :  { %10 = vsyncpa [#allocation3 + $0x1], 0  ;;  %s642_s12 = smov 0   ;;  %s644_s13 = smov 0  }
   0x2   :  { %s646_s14 = smov 0   ;;  %s648_s15 = smov 0  }
   0x3   :  { %s650_s16 = smov 0   ;;  %s652_s17 = smov 0  }
   0x4 LB: > { %s463_s18 = sadd.s32 4294967295, %s616_s17   ;;  %s464_s19 = sadd.s32 4294967294, %s616_s17   ;;  %s616_s17 = sphi %s652_s17, %s16_s17   ;;  %s612_s16 = sphi %s650_s16, %s848_s16   ;;  %s608_s15 = sphi %s648_s15, %s847_s15   ;;  %s604_s14 = sphi %s646_s14, %s846_s14   ;;  %s600_s13 = sphi %s644_s13, %s845_s13   ;;  %s596_s12 = sphi %s642_s12, %s844_s12  }
   0x5   : > { %s28_s20 = sadd.s32 1, %s612_s16  ;;  %s107_s21 = sadd.s32 1, %s604_s14 }
   0x6   : > { %p30_p0 = scmp.ge.s32.totalorder %s28_s20, 2  ;;  %p117_p1 = scmp.ne.s32.totalorder %s604_s14, %s600_s13 }
   0x7   : > { %p118_p2 = scmp.eq.s32.totalorder %s463_s18, 1  ;;  %p123_p3 = scmp.ne.s32.totalorder %s600_s13, %s596_s12 }
   0x8   : > { %s850_s20 = smov (%p30_p0, %s28_s20), 0  ;;  %p124_p5 = scmp.eq.s32.totalorder %s464_s19, 1 }
   0x9   : > { %p682_p4 = por %p118_p2, %p117_p1  ;;  %s102_s23 = ssub.s32 %s612_s16, %s850_s20 }
   0xa   : > { %p467_p6 = scmp.ge.s32.totalorder %s616_s17, 1  ;;  %p105_p7 = scmp.eq.s32.totalorder %s102_s23, 0 }
   0xb   : > { %p689_p8 = por %p124_p5, %p123_p3  ;;  %p161_p9 = scmp.lt.s32.totalorder %s616_s17, 3 }
   0xc   : > { %s695_s25 = scalar_select %p105_p7, %s604_s14, %s107_s21  }
   0xd   : > { %p162_p10 = pnand %p467_p6, %p161_p9 }
   0xe   : > { %v226_v0 = vld [vmem:[%s839_s1 + $0x10] sm:$0xff] (!%p162_p10)  ;;  %v224_v1 = vld [vmem:[%s839_s1] sm:$0xff] (!%p162_p10)  ;;  %v618_v2 = vmov (!%p162_p10), 0   ;;  %v227_v3 = vld [vmem:[%s839_s1 + $0x18] sm:$0xff] (!%p162_p10)  ;;  %p190_p11 = scmp.lt.s32.totalorder (!%p162_p10), %s608_s15, 1  ;;  %s186_s29 = sand.u32 (!%p162_p10), 1, %s600_s13  }
   0xf   : > { %165 = sbr.rel (%p162_p10) target bundleno = 190 (0xbe), region = 32  ;;  %537 = vset.pattern.permute.xlu1 (!%p162_p10), %v618_v2  ;;  %536 = vset.pattern.permute.xlu0 (!%p162_p10), %v618_v2  ;;  %v225_v4 = vld [vmem:[%s839_s1 + $0x8] sm:$0xff] (!%p162_p10)  ;;  %v228_v6 = vld [vmem:[%s839_s1 + $0x20] sm:$0xff] (!%p162_p10)  ;;  %v231_v7 = vld [vmem:[%s839_s1 + $0x38] sm:$0xff] (!%p162_p10)  ;;  %s468_s30 = sshll.u32 (!%p162_p10), %s186_s29, 7 }
  0x10   : > { %244 = vperm.xlu1 (!%p162_p10), %537, %v226_v0   ;;  %234 = vperm.xlu0 (!%p162_p10), %536, %v224_v1   ;;  %v229_v5 = vld [vmem:[%s839_s1 + $0x28] sm:$0xff] (!%p162_p10)  ;;  %v230_v8 = vld [vmem:[%s839_s1 + $0x30] sm:$0xff] (!%p162_p10)  ;;  %v288_v10 = vld [vmem:[%s840_s2] sm:$0xff] (!%p162_p10)  ;;  %s763_s4 = scalar_lea.vmem (!%p162_p10), [#allocation2], %s468_s30  ;;  %s477_s5 = sshll.u32 (!%p162_p10), %s608_s15, 11 }
  0x11   : > { %v289_v9 = vld [vmem:[%s840_s2 + $0x8] sm:$0xff] (!%p162_p10)  ;;  %v291_v11 = vld [vmem:[%s840_s2 + $0x18] sm:$0xff] (!%p162_p10)  ;;  %v290_v12 = vld [vmem:[%s840_s2 + $0x10] sm:$0xff] (!%p162_p10)  ;;  %s384_s6 = sshll.u32 (!%p162_p10), %s763_s4, 4  ;;  %s792_s9 = scalar_lea.sflag (!%p162_p10), [#allocation3], %s186_s29  ;;  %s784_s6 = int_to_ptr.vmem [resolvable:$true] %s384_s6 }
  0x12   : > { %v293_v13 = vld [vmem:[%s840_s2 + $0x28] sm:$0xff] (!%p162_p10)  ;;  %v292_v14 = vld [vmem:[%s840_s2 + $0x20] sm:$0xff] (!%p162_p10)  ;;  %v295_v15 = vld [vmem:[%s840_s2 + $0x38] sm:$0xff] (!%p162_p10)  ;;  %s538_s10 = scalar_lea.vmem (!%p162_p10), %s784_s6, 2048  ;;  %s619_s11 = smov (!%p162_p10), [#allocation2]  }
  0x13   : > { %v294_v16 = vld [vmem:[%s840_s2 + $0x30] sm:$0xff] (!%p162_p10)  ;;  %p539_p12 = scmp.ne.s32.totalorder (!%p162_p10), %s784_s6, %s538_s10  ;;  %s542_s18 = sshll.u32 (!%p162_p10), %s619_s11, 4  ;;  %s543_s18 = int_to_ptr.vmem [resolvable:$false] %s542_s18 }
  0x14   : > { %249 = vperm.xlu1 (!%p162_p10), %537, %v227_v3   ;;  %239 = vperm.xlu0 (!%p162_p10), %536, %v225_v4   ;;  %s544_s19 = scalar_lea.vmem (!%p162_p10), %s543_s18, 4096  ;;  %p545_p1 = scmp.lt.s32.totalorder (!%p162_p10), %s784_s6, %s543_s18 }
  0x15   : > { %p540_p13 = pnand (!%p162_p10), %p539_p12, %p682_p4  ;;  %p546_p2 = scmp.lt.s32.totalorder (!%p162_p10), %s544_s19, %s538_s10 }
  0x16   : > { %s191_s21 = scalar_select %p190_p11, %s608_s15, 1 }
  0x17   : > { %s782_s15 = scalar_lea.hbm %s841_s3, %s477_s5  ;;  %p541_p0 = pneg %p540_p13 }
  0x18   : > { %259 = vperm.xlu1 %537, %v229_v5   ;;  %254 = vperm.xlu0 %536, %v228_v6   ;;  %s476_s23 = sshll.u32 %s191_s21, 6  ;;  %p547_p3 = por %p546_p2, %p545_p1 }
  0x19   : > { %s750_s28 = scalar_lea.vmem %s838_s0, %s476_s23 }
  0x1a   : > { %v200_v21 = vld [vmem:[%s750_s28] sm:$0xff]  ;;  %v201_v22 = vld [vmem:[%s750_s28 + $0x8] sm:$0xff]  ;;  %v202_v25 = vld [vmem:[%s750_s28 + $0x10] sm:$0xff]  ;;  %p548_p5 = pnand %p547_p3, %p541_p0 }
  0x1b   : > { %v208_v26 = vunpack.c.l.bf16 %v200_v21  ;;  %v209_v27 = vunpack.c.h.bf16 %v200_v21  ;;  %v203_v28 = vld [vmem:[%s750_s28 + $0x18] sm:$0xff]  ;;  %v210_v29 = vunpack.c.l.bf16 %v201_v22  ;;  %v211_v30 = vunpack.c.h.bf16 %v201_v22  ;;  %v205_v41 = vld [vmem:[%s750_s28 + $0x28] sm:$0xff]  ;;  %v204_v42 = vld [vmem:[%s750_s28 + $0x20] sm:$0xff] }
  0x1c   : > { %269 = vperm.xlu1 %537, %v231_v7   ;;  %264 = vperm.xlu0 %536, %v230_v8   ;;  %v212_v33 = vunpack.c.l.bf16 %v202_v25  ;;  %v213_v34 = vunpack.c.h.bf16 %v202_v25  ;;  %v214_v35 = vunpack.c.l.bf16 %v203_v28  ;;  %v215_v36 = vunpack.c.h.bf16 %v203_v28  ;;  %v207_v57 = vld [vmem:[%s750_s28 + $0x38] sm:$0xff]  ;;  %v206_v58 = vld [vmem:[%s750_s28 + $0x30] sm:$0xff] }
  0x1d   : > { %v218_v49 = vunpack.c.l.bf16 %v205_v41  ;;  %v219_v50 = vunpack.c.h.bf16 %v205_v41  ;;  %v216_v51 = vunpack.c.l.bf16 %v204_v42  ;;  %v217_v52 = vunpack.c.h.bf16 %v204_v42 }
  0x1e   : > { %v222_v1 = vunpack.c.l.bf16 %v207_v57  ;;  %v223_v2 = vunpack.c.h.bf16 %v207_v57  ;;  %v220_v3 = vunpack.c.l.bf16 %v206_v58  ;;  %v221_v4 = vunpack.c.h.bf16 %v206_v58 }
  0x20   : > { %303 = vperm.xlu1 %537, %v289_v9   ;;  %298 = vperm.xlu0 %536, %v288_v10  }
  0x24   : > { %313 = vperm.xlu1 %537, %v291_v11   ;;  %308 = vperm.xlu0 %536, %v290_v12  }
  0x28   : > { %323 = vperm.xlu1 %537, %v293_v13   ;;  %318 = vperm.xlu0 %536, %v292_v14  }
  0x2c   : > { %333 = vperm.xlu1 %537, %v295_v15   ;;  %328 = vperm.xlu0 %536, %v294_v16  }
  0x8f   : > { %v245_v17 = vpop.permute.xlu1 %244  ;;  %v235_v18 = vpop.permute.xlu0 %234 }
  0x90   : > { %v272_v37 = vmul.f32 %v235_v18, %v208_v26  ;;  %v273_v38 = vmul.f32 %v235_v18, %v209_v27  ;;  %v276_v53 = vmul.f32 %v245_v17, %v212_v33  ;;  %v277_v54 = vmul.f32 %v245_v17, %v213_v34 }
  0x93   : > { %v250_v19 = vpop.permute.xlu1 %249  ;;  %v240_v20 = vpop.permute.xlu0 %239 }
  0x94   : > { %v274_v39 = vmul.f32 %v240_v20, %v210_v29  ;;  %v275_v40 = vmul.f32 %v240_v20, %v211_v30  ;;  %v278_v55 = vmul.f32 %v250_v19, %v214_v35  ;;  %v279_v56 = vmul.f32 %v250_v19, %v215_v36 }
  0x97   : > { %v260_v23 = vpop.permute.xlu1 %259  ;;  %v255_v24 = vpop.permute.xlu0 %254 }
  0x98   : > { %v282_v5 = vmul.f32 %v260_v23, %v218_v49  ;;  %v283_v6 = vmul.f32 %v260_v23, %v219_v50  ;;  %v280_v7 = vmul.f32 %v255_v24, %v216_v51  ;;  %v281_v8 = vmul.f32 %v255_v24, %v217_v52 }
  0x9b   : > { %v270_v31 = vpop.permute.xlu1 %269  ;;  %v265_v32 = vpop.permute.xlu0 %264 }
  0x9c   : > { %v286_v15 = vmul.f32 %v270_v31, %v222_v1  ;;  %v287_v16 = vmul.f32 %v270_v31, %v223_v2  ;;  %v284_v17 = vmul.f32 %v265_v32, %v220_v3  ;;  %v285_v18 = vmul.f32 %v265_v32, %v221_v4 }
  0x9f   : > { %v304_v43 = vpop.permute.xlu1 %303  ;;  %v299_v44 = vpop.permute.xlu0 %298 }
  0xa0   : > { %v338_v45 = vadd.f32 %v304_v43, %v274_v39  ;;  %v339_v46 = vadd.f32 %v304_v43, %v275_v40  ;;  %v336_v47 = vadd.f32 %v299_v44, %v272_v37  ;;  %v337_v48 = vadd.f32 %v299_v44, %v273_v38 }
  0xa2   : > { %354 = vst [vmem:[%s763_s4 + $0x10] sm:$0xff] %v338_v45  ;;  %355 = vst [vmem:[%s763_s4 + $0x18] sm:$0xff] %v339_v46 }
  0xa3   : > { %352 = vst [vmem:[%s763_s4] sm:$0xff] %v336_v47  ;;  %353 = vst [vmem:[%s763_s4 + $0x8] sm:$0xff] %v337_v48  ;;  %v314_v59 = vpop.permute.xlu1 %313  ;;  %v309_v60 = vpop.permute.xlu0 %308 }
  0xa4   : > { %v342_v61 = vadd.f32 %v314_v59, %v278_v55  ;;  %v343_v62 = vadd.f32 %v314_v59, %v279_v56  ;;  %v340_v63 = vadd.f32 %v309_v60, %v276_v53  ;;  %v341_v0 = vadd.f32 %v309_v60, %v277_v54 }
  0xa6   : > { %358 = vst [vmem:[%s763_s4 + $0x30] sm:$0xff] %v342_v61  ;;  %359 = vst [vmem:[%s763_s4 + $0x38] sm:$0xff] %v343_v62 }
  0xa7   : > { %356 = vst [vmem:[%s763_s4 + $0x20] sm:$0xff] %v340_v63  ;;  %357 = vst [vmem:[%s763_s4 + $0x28] sm:$0xff] %v341_v0  ;;  %v324_v9 = vpop.permute.xlu1 %323  ;;  %v319_v10 = vpop.permute.xlu0 %318 }
  0xa8   : > { %v346_v11 = vadd.f32 %v324_v9, %v282_v5  ;;  %v347_v12 = vadd.f32 %v324_v9, %v283_v6  ;;  %v344_v13 = vadd.f32 %v319_v10, %v280_v7  ;;  %v345_v14 = vadd.f32 %v319_v10, %v281_v8 }
  0xaa   : > { %362 = vst [vmem:[%s763_s4 + $0x50] sm:$0xff] %v346_v11  ;;  %363 = vst [vmem:[%s763_s4 + $0x58] sm:$0xff] %v347_v12 }
  0xab   : > { %360 = vst [vmem:[%s763_s4 + $0x40] sm:$0xff] %v344_v13  ;;  %361 = vst [vmem:[%s763_s4 + $0x48] sm:$0xff] %v345_v14  ;;  %v334_v19 = vpop.permute.xlu1 %333  ;;  %v329_v20 = vpop.permute.xlu0 %328 }
  0xac   : > { %v350_v21 = vadd.f32 %v334_v19, %v286_v15  ;;  %v351_v22 = vadd.f32 %v334_v19, %v287_v16  ;;  %v348_v23 = vadd.f32 %v329_v20, %v284_v17  ;;  %v349_v24 = vadd.f32 %v329_v20, %v285_v18 }
  0xae   : > { %366 = vst [vmem:[%s763_s4 + $0x70] sm:$0xff] %v350_v21  ;;  %367 = vst [vmem:[%s763_s4 + $0x78] sm:$0xff] %v351_v22 }
  0xaf   : > { %364 = vst [vmem:[%s763_s4 + $0x60] sm:$0xff] %v348_v23  ;;  %365 = vst [vmem:[%s763_s4 + $0x68] sm:$0xff] %v349_v24 }
  0xb0   : > { %551 = shalt.err (!%p548_p5)
}
  0xb1   : > { %s552_s21 = scalar_lea.hbm %s782_s15, 2048  ;;  %s556_s27 = scalar_lea.hbm %s841_s3, 4096 }
  0xb2   : > { %p553_p6 = scmp.ne.s32.totalorder %s782_s15, %s552_s21  ;;  %p557_p10 = scmp.lt.u32.totalorder %s782_s15, %s841_s3 }
  0xb3   : > { %p558_p11 = scmp.lt.u32.totalorder %s556_s27, %s552_s21  ;;  %p560_p13 = scmp.lt.u32.totalorder %s552_s21, %s782_s15 }
  0xb4   : > { %p554_p7 = pnand %p553_p6, %p682_p4 }
  0xb5   : > { %p559_p12 = por %p558_p11, %p557_p10 }
  0xb6   : > { %p555_p9 = pneg %p554_p7 }
  0xb7   : > { %p561_p0 = por %p560_p13, %p559_p12 }
  0xb9   : > { %p562_p1 = pnand %p561_p0, %p555_p9 }
  0xbb   : > { %565 = shalt.err (!%p562_p1)
}
  0xbc   : > { %s620_s30 = smov 256   ;;  %s621_s4 = smov 16  }
  0xbd   : > { %478 = dma.vmem_to_hbm [thread:$0]  (%p682_p4), %s784_s6, 2048, %s782_s15, %s792_s9, %s620_s30, %s620_s30, %s621_s4  }
  0xbe PF: > { %p484_p2 = scmp.ge.s32.totalorder %s616_s17, 2  ;;  %s399_s5 = sand.u32 1, %s596_s12  }
  0xbf   : > { %s400_s7 = scalar_lea.sflag [#allocation3], %s399_s5 }
  0xc0   : > { %p481_p3 = pnand %p484_p2, %p689_p8 }
  0xc2   : > { %591 = dma.done.wait (!%p481_p3), %s400_s7, 2048  }
  0xc3   : > { %593 = vsyncadd (!%p481_p3), %s400_s7, 4294965248  ;;  %s16_s17 = sadd.s32 1, %s616_s17   ;;  %s844_s12 = smov %s600_s13 }
  0xc4   : > { %p13_p5 = scmp.ge.s32.totalorder %s16_s17, 4   ;;  %s845_s13 = smov %s604_s14 }
  0xc5   : > { %s846_s14 = smov %s695_s25  ;;  %s847_s15 = smov %s612_s16 }
  0xc6   : > { %s848_s16 = smov %s850_s20  ;;  %15 = sbr.rel (!%p13_p5) target bundleno = 4 (0x4), region = 67 }
  0xcd   :  { %405 = vsyncpa [#allocation3], 1 }
  0xce   :  { %407 = vsyncpa [#allocation3 + $0x1], 1 }

// kernel: imageknet_forward.2
= control target key start
LH: loop header
LB: loop body
LE: loop exit
PB: predicated region body
PF: predicated region fallthrough
CT: control target
= control target key end

     0   :  { %s892_s15 = smov 0   ;;  %s894_s16 = smov 0   ;;  %s1061_s0 = inlined_call_operand.vmem [shape: f32[2,12,256], index: 0, kind: input, shape index: {}]   ;;  %s1062_s1 = inlined_call_operand.vmem [shape: f32[64,12], index: 1, kind: input, shape index: {}]   ;;  %s1063_s2 = inlined_call_operand.vmem [shape: bf16[2,64,256], index: 2, kind: output, shape index: {0}]   ;;  %s1064_s3 = inlined_call_operand.vmem [shape: f32[2,64,1], index: 3, kind: output, shape index: {1}]   ;;  %s1065_s4 = inlined_call_operand.vmem [shape: f32[2,64,1], index: 4, kind: output, shape index: {2}]  }
   0x1   :  { %s896_s17 = smov 0  }
   0x2 LB: > { %s27_s18 = sadd.s32 1, %s859_s16  ;;  %p766_p0 = scmp.ge.s32.totalorder %s863_s17, 1  ;;  %s863_s17 = sphi %s896_s17, %s15_s17   ;;  %s859_s16 = sphi %s894_s16, %s1067_s16   ;;  %s855_s15 = sphi %s892_s15, %s1066_s15  }
   0x3   : > { %p29_p1 = scmp.ge.s32.totalorder %s27_s18, 2  ;;  %p188_p2 = scmp.lt.s32.totalorder %s863_s17, 3 }
   0x5   : > { %s1069_s18 = smov (%p29_p1, %s27_s18), 0  ;;  %p189_p3 = pnand %p766_p0, %p188_p2 }
   0x6   : > { %p233_p4 = scmp.lt.s32.totalorder (!%p189_p3), %s855_s15, 1  ;;  %v865_v0 = vmov (!%p189_p3), 0.0   ;;  %vm320_vm0 = vcmask (!%p189_p3), 1043456   ;;  %vm866_vm1 = vmmov (!%p189_p3), 1   ;;  %v287_v7 = vld [vmem:[%s1062_s1] sm:$0xff] (!%p189_p3)  ;;  %vm295_vm3 = vcmask (!%p189_p3), 97280  }
   0x7   : > { %192 = sbr.rel (%p189_p3) target bundleno = 416 (0x1a0), region = 28  ;;  %391 = vmatprep.mubr.f32.mxu0 (!%p189_p3), %v865_v0  ;;  %415 = vmatprep.mubr.f32.mxu1 (!%p189_p3), %v865_v0  ;;  %vm808_vm2 = vmpackc.low (!%p189_p3), %vm320_vm0, %vm866_vm1  ;;  %v291_v8 = vld [vmem:[%s1062_s1 + $0x20] sm:$0xff] (!%p189_p3)  ;;  %v292_v9 = vld [vmem:[%s1062_s1 + $0x28] sm:$0xff] (!%p189_p3)  ;;  %vm266_vm4 = vcmask (!%p189_p3), 7168  }
   0x8   : > { %v288_v10 = vld [vmem:[%s1062_s1 + $0x8] sm:$0xff] (!%p189_p3)  ;;  %v289_v11 = vld [vmem:[%s1062_s1 + $0x10] sm:$0xff] (!%p189_p3)  ;;  %v290_v13 = vld [vmem:[%s1062_s1 + $0x18] sm:$0xff] (!%p189_p3) }
   0x9   : > { %v293_v12 = vld [vmem:[%s1062_s1 + $0x30] sm:$0xff] (!%p189_p3)  ;;  %v294_v14 = vld [vmem:[%s1062_s1 + $0x38] sm:$0xff] (!%p189_p3) }
   0xe   : > { %s1071_s15 = smov (!%p233_p4, %s855_s15), 1 }
   0xf   : > { %s795_s19 = sshll.u32 %s1071_s15, 5  ;;  %s796_s13 = sshll.u32 %s1071_s15, 6 }
  0x10   : > { %s240_s22 = scalar_lea.vmem %s1061_s0, %s795_s19  ;;  %s952_s20 = scalar_lea.vmem %s1064_s3, %s796_s13 }
  0x11   : > { %v284_v1 = vld [vmem:[%s240_s22 + $0x8] sm:$0xff]  ;;  %v286_v2 = vld [vmem:[%s240_s22 + $0x18] sm:$0xf]  ;;  %v283_v3 = vld [vmem:[%s240_s22] sm:$0xff]  ;;  %s957_s23 = scalar_lea.vmem %s1065_s4, %s796_s13  ;;  %267 = vst.msk [vmem:[%s952_s20] sm:$0xff] %vm266_vm4, %v865_v0  ;;  %s994_s25 = scalar_lea.vmem %s1063_s2, %s796_s13 }
  0x12   : > { %v807_v4 = vpack.c.bf16 %v286_v2, %v284_v1  ;;  %v285_v5 = vld [vmem:[%s240_s22 + $0x10] sm:$0xf]  ;;  %268 = vst.msk [vmem:[%s952_s20 + $0x8] sm:$0xff] %vm266_vm4, %v865_v0  ;;  %269 = vst.msk [vmem:[%s952_s20 + $0x10] sm:$0xff] %vm266_vm4, %v865_v0 }
  0x13   : > { %v810_v6 = vpack.c.bf16 %v285_v5, %v283_v3  ;;  %270 = vst.msk [vmem:[%s952_s20 + $0x18] sm:$0xff] %vm266_vm4, %v865_v0  ;;  %271 = vst.msk [vmem:[%s952_s20 + $0x20] sm:$0xff] %vm266_vm4, %v865_v0 }
  0x14   : > { %809 = vmatprep.subr.msk.bf16.mxu0 %vm808_vm2, %v807_v4  ;;  %813 = vmatprep.subr.msk.bf16.mxu1 %vm808_vm2, %v807_v4  ;;  %272 = vst.msk [vmem:[%s952_s20 + $0x28] sm:$0xff] %vm266_vm4, %v865_v0  ;;  %273 = vst.msk [vmem:[%s952_s20 + $0x30] sm:$0xff] %vm266_vm4, %v865_v0 }
  0x15   : > { %812 = vmatpush1.bf16.msk.msra.mxu0 %vm808_vm2, %v810_v6  ;;  %814 = vmatpush1.bf16.msk.msra.mxu1 %vm808_vm2, %v810_v6  ;;  %274 = vst.msk [vmem:[%s952_s20 + $0x38] sm:$0xff] %vm266_vm4, %v865_v0  ;;  %275 = vst.msk [vmem:[%s957_s23] sm:$0xff] %vm266_vm4, %v865_v0 }
  0x16   : > { %276 = vst.msk [vmem:[%s957_s23 + $0x8] sm:$0xff] %vm266_vm4, %v865_v0  ;;  %277 = vst.msk [vmem:[%s957_s23 + $0x10] sm:$0xff] %vm266_vm4, %v865_v0 }
  0x17   : > { %278 = vst.msk [vmem:[%s957_s23 + $0x18] sm:$0xff] %vm266_vm4, %v865_v0  ;;  %279 = vst.msk [vmem:[%s957_s23 + $0x20] sm:$0xff] %vm266_vm4, %v865_v0 }
  0x18   : > { %777 = vmatmul.mubr.msk.f32.vlgmr.msra.gmra.mrb[0].mxu0 %vm295_vm3, %v287_v7  ;;  %781 = vmatmul.mubr.msk.f32.vlgmr.msra.gmra.mrb[0].mxu1 %vm295_vm3, %v291_v8  ;;  %280 = vst.msk [vmem:[%s957_s23 + $0x28] sm:$0xff] %vm266_vm4, %v865_v0  ;;  %281 = vst.msk [vmem:[%s957_s23 + $0x30] sm:$0xff] %vm266_vm4, %v865_v0  ;;  %v496_v7 = vld [vmem:[%s952_s20] sm:$0xff] }
  0x19   : > { %421 = vmatprep.mubr.f32.mxu1 %v865_v0  ;;  %397 = vmatprep.mubr.f32.mxu0 %v865_v0  ;;  %282 = vst.msk [vmem:[%s957_s23 + $0x38] sm:$0xff] %vm266_vm4, %v865_v0 }
  0x1c   : > { %782 = vmatmul.mubr.msk.f32.gmra.mrb[2].mxu1 %vm295_vm3, %v292_v9  ;;  %778 = vmatmul.mubr.msk.f32.gmra.mrb[2].mxu0 %vm295_vm3, %v288_v10  ;;  %v501_v10 = vld [vmem:[%s952_s20 + $0x28] sm:$0xff] }
  0x1d   : > { %403 = vmatprep.mubr.f32.mxu0 %v865_v0  ;;  %427 = vmatprep.mubr.f32.mxu1 %v865_v0 }
  0x20   : > { %779 = vmatmul.mubr.msk.f32.gmra.mrb[4].mxu0 %vm295_vm3, %v289_v11  ;;  %783 = vmatmul.mubr.msk.f32.gmra.mrb[4].mxu1 %vm295_vm3, %v293_v12  ;;  %v500_v11 = vld [vmem:[%s952_s20 + $0x20] sm:$0xff] }
  0x21   : > { %409 = vmatprep.mubr.f32.mxu0 %v865_v0  ;;  %433 = vmatprep.mubr.f32.mxu1 %v865_v0 }
  0x24   : > { %780 = vmatmul.mubr.msk.f32.gmra.mrb[6].mxu0 %vm295_vm3, %v290_v13  ;;  %784 = vmatmul.mubr.msk.f32.gmra.mrb[6].mxu1 %vm295_vm3, %v294_v14 }
  0xeb   : > { %v393_v15 = vpop.f32.mrb[0].mxu0  ;;  %v417_v16 = vpop.f32.mrb[0].mxu1 }
  0xec   : > { %v395_v17 = vpop.f32.mrb[1].mxu0  ;;  %v419_v18 = vpop.f32.mrb[1].mxu1  ;;  %v553_v19 = vmul.f32 %v393_v15, %v393_v15  ;;  %v561_v20 = vmul.f32 %v417_v16, %v417_v16 }
  0xed   : > { %v799_v21 = vpack.c.bf16 %v395_v17, %v393_v15  ;;  %v803_v22 = vpack.c.bf16 %v419_v18, %v417_v16  ;;  %v504_v23 = vadd.f32 %v395_v17, %v393_v15  ;;  %v516_v24 = vadd.f32 %v419_v18, %v417_v16  ;;  %v545_v16 = vld [vmem:[%s957_s23] sm:$0xff] }
  0xee   : > { %v554_v25 = vmul.f32 %v395_v17, %v395_v17  ;;  %v562_v26 = vmul.f32 %v419_v18, %v419_v18  ;;  %v546_v17 = vld [vmem:[%s957_s23 + $0x8] sm:$0xff] }
  0xef   : > { %488 = vst [vmem:[%s994_s25] sm:$0xff] %v799_v21  ;;  %492 = vst [vmem:[%s994_s25 + $0x20] sm:$0xff] %v803_v22  ;;  %v423_v27 = vpop.f32.mrb[2].mxu1  ;;  %505 = vadd.xlane.f32.xlu0 %v504_v23  ;;  %v399_v28 = vpop.f32.mrb[2].mxu0  ;;  %v549_v22 = vld [vmem:[%s957_s23 + $0x20] sm:$0xff]  ;;  %v550_v23 = vld [vmem:[%s957_s23 + $0x28] sm:$0xff] }
  0xf0   : > { %v425_v29 = vpop.f32.mrb[3].mxu1  ;;  %v401_v30 = vpop.f32.mrb[3].mxu0  ;;  %v569_v31 = vadd.f32 %v554_v25, %v553_v19  ;;  %v555_v32 = vmul.f32 %v399_v28, %v399_v28  ;;  %v581_v33 = vadd.f32 %v562_v26, %v561_v20  ;;  %v563_v34 = vmul.f32 %v423_v27, %v423_v27 }
  0xf1   : > { %v804_v35 = vpack.c.bf16 %v425_v29, %v423_v27  ;;  %v800_v36 = vpack.c.bf16 %v401_v30, %v399_v28  ;;  %v519_v37 = vadd.f32 %v425_v29, %v423_v27  ;;  %v556_v38 = vmul.f32 %v401_v30, %v401_v30 }
  0xf2   : > { %v564_v39 = vmul.f32 %v425_v29, %v425_v29  ;;  %v507_v40 = vadd.f32 %v401_v30, %v399_v28  ;;  %v497_v28 = vld [vmem:[%s952_s20 + $0x8] sm:$0xff]  ;;  %v498_v29 = vld [vmem:[%s952_s20 + $0x10] sm:$0xff] }
  0xf3   : > { %493 = vst [vmem:[%s994_s25 + $0x28] sm:$0xff] %v804_v35  ;;  %489 = vst [vmem:[%s994_s25 + $0x8] sm:$0xff] %v800_v36  ;;  %520 = vadd.xlane.f32.xlu1 %v519_v37  ;;  %517 = vadd.xlane.f32.xlu0 %v516_v24  ;;  %v572_v41 = vadd.f32 %v556_v38, %v555_v32  ;;  %v405_v42 = vpop.f32.mrb[4].mxu0  ;;  %v429_v43 = vpop.f32.mrb[4].mxu1  ;;  %v499_v35 = vld [vmem:[%s952_s20 + $0x18] sm:$0xff] }
  0xf4   : > { %v584_v44 = vadd.f32 %v564_v39, %v563_v34  ;;  %v407_v45 = vpop.f32.mrb[5].mxu0  ;;  %v431_v46 = vpop.f32.mrb[5].mxu1  ;;  %v557_v47 = vmul.f32 %v405_v42, %v405_v42  ;;  %v565_v48 = vmul.f32 %v429_v43, %v429_v43  ;;  %v502_v34 = vld [vmem:[%s952_s20 + $0x30] sm:$0xff] }
  0xf5   : > { %v801_v49 = vpack.c.bf16 %v407_v45, %v405_v42  ;;  %v805_v50 = vpack.c.bf16 %v431_v46, %v429_v43  ;;  %v510_v51 = vadd.f32 %v407_v45, %v405_v42  ;;  %v522_v52 = vadd.f32 %v431_v46, %v429_v43 }
  0xf6   : > { %v558_v53 = vmul.f32 %v407_v45, %v407_v45  ;;  %v566_v54 = vmul.f32 %v431_v46, %v431_v46  ;;  %v551_v46 = vld [vmem:[%s957_s23 + $0x30] sm:$0xff] }
  0xf7   : > { %570 = vadd.xlane.f32.xlu0 %v569_v31  ;;  %573 = vadd.xlane.f32.xlu1 %v572_v41  ;;  %490 = vst [vmem:[%s994_s25 + $0x10] sm:$0xff] %v801_v49  ;;  %v411_v55 = vpop.f32.mrb[6].mxu0  ;;  %494 = vst [vmem:[%s994_s25 + $0x30] sm:$0xff] %v805_v50  ;;  %v435_v56 = vpop.f32.mrb[6].mxu1  ;;  %v503_v41 = vld [vmem:[%s952_s20 + $0x38] sm:$0xff] }
  0xf8   : > { %v413_v57 = vpop.f32.mrb[7].mxu0  ;;  %v437_v58 = vpop.f32.mrb[7].mxu1  ;;  %v575_v59 = vadd.f32 %v558_v53, %v557_v47  ;;  %v587_v60 = vadd.f32 %v566_v54, %v565_v48  ;;  %v559_v61 = vmul.f32 %v411_v55, %v411_v55  ;;  %v567_v62 = vmul.f32 %v435_v56, %v435_v56  ;;  %v548_v47 = vld [vmem:[%s957_s23 + $0x18] sm:$0xff] }
  0xf9   : > { %v802_v63 = vpack.c.bf16 %v413_v57, %v411_v55  ;;  %v560_v0 = vmul.f32 %v413_v57, %v413_v57  ;;  %v806_v1 = vpack.c.bf16 %v437_v58, %v435_v56  ;;  %v568_v2 = vmul.f32 %v437_v58, %v437_v58 }
  0xfa   : > { %v513_v3 = vadd.f32 %v413_v57, %v411_v55  ;;  %v525_v4 = vadd.f32 %v437_v58, %v435_v56 }
  0xfb   : > { %582 = vadd.xlane.f32.xlu0 %v581_v33  ;;  %585 = vadd.xlane.f32.xlu1 %v584_v44  ;;  %491 = vst [vmem:[%s994_s25 + $0x18] sm:$0xff] %v802_v63  ;;  %495 = vst [vmem:[%s994_s25 + $0x38] sm:$0xff] %v806_v1  ;;  %v578_v5 = vadd.f32 %v560_v0, %v559_v61  ;;  %v590_v6 = vadd.f32 %v568_v2, %v567_v62 }
  0xff   : > { %508 = vadd.xlane.f32.xlu0 %v507_v40  ;;  %511 = vadd.xlane.f32.xlu1 %v510_v51  ;;  %v547_v40 = vld [vmem:[%s957_s23 + $0x10] sm:$0xff] }
 0x103   : > { %523 = vadd.xlane.f32.xlu0 %v522_v52  ;;  %514 = vadd.xlane.f32.xlu1 %v513_v3  ;;  %v552_v52 = vld [vmem:[%s957_s23 + $0x38] sm:$0xff] }
 0x107   : > { %576 = vadd.xlane.f32.xlu0 %v575_v59  ;;  %526 = vadd.xlane.f32.xlu1 %v525_v4 }
 0x10b   : > { %588 = vadd.xlane.f32.xlu0 %v587_v60  ;;  %579 = vadd.xlane.f32.xlu1 %v578_v5 }
 0x10f   : > { %591 = vadd.xlane.f32.xlu1 %v590_v6 }
 0x17c   : > { %v506_v8 = vpop.xlane.xlu0 %505 }
 0x17d   : > { %v528_v9 = vadd.f32 %v506_v8, %v496_v7 }
 0x17f   : > { %537 = vst.msk [vmem:[%s952_s20] sm:$0xff] %vm266_vm4, %v528_v9 }
 0x180   : > { %v521_v12 = vpop.xlane.xlu1 %520  ;;  %v518_v13 = vpop.xlane.xlu0 %517 }
 0x181   : > { %v533_v14 = vadd.f32 %v521_v12, %v501_v10  ;;  %v532_v15 = vadd.f32 %v518_v13, %v500_v11 }
 0x183   : > { %542 = vst.msk [vmem:[%s952_s20 + $0x28] sm:$0xff] %vm266_vm4, %v533_v14  ;;  %541 = vst.msk [vmem:[%s952_s20 + $0x20] sm:$0xff] %vm266_vm4, %v532_v15 }
 0x184   : > { %v571_v18 = vpop.xlane.xlu0 %570  ;;  %v574_v19 = vpop.xlane.xlu1 %573 }
 0x185   : > { %v593_v20 = vadd.f32 %v571_v18, %v545_v16  ;;  %v594_v21 = vadd.f32 %v574_v19, %v546_v17 }
 0x187   : > { %601 = vst.msk [vmem:[%s957_s23] sm:$0xff] %vm266_vm4, %v593_v20  ;;  %602 = vst.msk [vmem:[%s957_s23 + $0x8] sm:$0xff] %vm266_vm4, %v594_v21 }
 0x188   : > { %v583_v24 = vpop.xlane.xlu0 %582  ;;  %v586_v25 = vpop.xlane.xlu1 %585 }
 0x189   : > { %v597_v26 = vadd.f32 %v583_v24, %v549_v22  ;;  %v598_v27 = vadd.f32 %v586_v25, %v550_v23 }
 0x18b   : > { %605 = vst.msk [vmem:[%s957_s23 + $0x20] sm:$0xff] %vm266_vm4, %v597_v26  ;;  %606 = vst.msk [vmem:[%s957_s23 + $0x28] sm:$0xff] %vm266_vm4, %v598_v27 }
 0x18c   : > { %v509_v30 = vpop.xlane.xlu0 %508  ;;  %v512_v31 = vpop.xlane.xlu1 %511 }
 0x18d   : > { %v529_v32 = vadd.f32 %v509_v30, %v497_v28  ;;  %v530_v33 = vadd.f32 %v512_v31, %v498_v29 }
 0x18f   : > { %538 = vst.msk [vmem:[%s952_s20 + $0x8] sm:$0xff] %vm266_vm4, %v529_v32  ;;  %539 = vst.msk [vmem:[%s952_s20 + $0x10] sm:$0xff] %vm266_vm4, %v530_v33 }
 0x190   : > { %v524_v36 = vpop.xlane.xlu0 %523  ;;  %v515_v37 = vpop.xlane.xlu1 %514 }
 0x191   : > { %v534_v38 = vadd.f32 %v524_v36, %v502_v34  ;;  %v531_v39 = vadd.f32 %v515_v37, %v499_v35 }
 0x193   : > { %543 = vst.msk [vmem:[%s952_s20 + $0x30] sm:$0xff] %vm266_vm4, %v534_v38  ;;  %540 = vst.msk [vmem:[%s952_s20 + $0x18] sm:$0xff] %vm266_vm4, %v531_v39 }
 0x194   : > { %v577_v42 = vpop.xlane.xlu0 %576  ;;  %v527_v43 = vpop.xlane.xlu1 %526 }
 0x195   : > { %v595_v44 = vadd.f32 %v577_v42, %v547_v40  ;;  %v535_v45 = vadd.f32 %v527_v43, %v503_v41 }
 0x197   : > { %603 = vst.msk [vmem:[%s957_s23 + $0x10] sm:$0xff] %vm266_vm4, %v595_v44  ;;  %544 = vst.msk [vmem:[%s952_s20 + $0x38] sm:$0xff] %vm266_vm4, %v535_v45 }
 0x198   : > { %v589_v48 = vpop.xlane.xlu0 %588  ;;  %v580_v49 = vpop.xlane.xlu1 %579 }
 0x199   : > { %v599_v50 = vadd.f32 %v589_v48, %v551_v46  ;;  %v596_v51 = vadd.f32 %v580_v49, %v548_v47 }
 0x19b   : > { %607 = vst.msk [vmem:[%s957_s23 + $0x30] sm:$0xff] %vm266_vm4, %v599_v50  ;;  %604 = vst.msk [vmem:[%s957_s23 + $0x18] sm:$0xff] %vm266_vm4, %v596_v51 }
 0x19c   : > { %v592_v53 = vpop.xlane.xlu1 %591 }
 0x19d   : > { %v600_v54 = vadd.f32 %v592_v53, %v552_v52 }
 0x19f   : > { %608 = vst.msk [vmem:[%s957_s23 + $0x38] sm:$0xff] %vm266_vm4, %v600_v54 }
 0x1a0 PF: > { %s15_s17 = sadd.s32 1, %s863_s17   ;;  %s1066_s15 = smov %s859_s16 }
 0x1a1   : > { %p12_p5 = scmp.ge.s32.totalorder %s15_s17, 4   ;;  %s1067_s16 = smov %s1069_s18 }
 0x1a3   :  { %14 = sbr.rel (!%p12_p5) target bundleno = 2 (0x2), region = 86 }

</bundles_post_ra>
